<compile_context>
chip_gen: v7x
topology: tpu7x:2x2x1
jax: 0.10.0
libtpu: 0.0.40
codegen_flags: <defaults>
</compile_context>

<pallas_src>
import functools

import jax
import jax.numpy as jnp
from jax.experimental import pallas as pl
from jax.experimental.pallas import tpu as pltpu


def make_discrete_actor_kernel(action_dim: int, action_space_size: int):
    A, C = action_dim, action_space_size
    AC = A * C

    def kernel(state_ref, w1_ref, b1_ref, w2_ref, b2_ref, wh_ref, bh_ref, bd_ref,
               out_ref):
        # ---- feature extractor: Linear -> ReLU -> Linear -> ReLU ----
        x = state_ref[...]                                                    # (tb, S) f32
        h1 = jnp.dot(x, w1_ref[...], preferred_element_type=jnp.float32) + b1_ref[...]
        h1 = jnp.maximum(h1, 0.0)                                             # (tb, H)
        h2 = jnp.dot(h1, w2_ref[...], preferred_element_type=jnp.float32) + b2_ref[...]
        h2 = jnp.maximum(h2, 0.0)                                             # (tb, H)

        # ---- all action heads in ONE matmul: (tb, H) @ (H, A*C) ----
        logits = jnp.dot(h2, wh_ref[...], preferred_element_type=jnp.float32)
        logits = logits + bh_ref[...]                                         # (tb, AC)
        rows = logits.shape[0]

        # ---- vectorized per-head stable softmax over the whole slab ----
        # Per-head max (matches the module's per-head stabilization exactly);
        # A tiny lane-slice reduces, broadcast back into slab layout.
        m_slab = jnp.concatenate(
            [jnp.broadcast_to(
                jnp.max(logits[:, a * C:(a + 1) * C], axis=-1, keepdims=True),
                (rows, C))
             for a in range(A)],
            axis=-1)                                                          # (tb, AC)

        e = jnp.exp(logits - m_slab)                                          # ONE EUP pass

        # Per-head denominator broadcast to every column in one MXU matmul with a
        # constant block-diagonal ones matrix: denom[b, j] = sum_{k in head(j)} e[b, k].
        denom = jnp.dot(e, bd_ref[...], preferred_element_type=jnp.float32)   # (tb, AC)

        # Exact division (the approx reciprocal broke the sum-to-1 tolerance).
        # The additive +1e-8 mirrors the module's `probs / (probs.sum(-1) + 1e-8)`.
        # TODO(synk): PyTorch's NaN/Inf repair path (randn_like*0.01 substitution and
        # the uniform fallback) is omitted: with finite weights/inputs logits are finite.
        out_ref[...] = (e / (denom + 1e-8)).astype(out_ref.dtype)             # single store

    return kernel


def _round_up(x: int, m: int) -> int:
    return ((x + m - 1) // m) * m


@functools.partial(jax.jit, static_argnames=("tile_b",))
def discrete_actor_forward(state, params, *, tile_b: int = 2048):
    """state (B, state_dim) or (state_dim,) -> action probs (B, action_dim, C)."""
    if state.ndim == 1:                      # mirror torch's unsqueeze(0)
        state = state[None, :]
    state = state.astype(jnp.float32)

    w1, b1, w2, b2, wh, bh = params
    B, S = state.shape
    H = w1.shape[1]
    A, _, C = wh.shape
    AC = A * C

    # Pack all heads into one lane-dense weight/bias: W_flat[h, a*C + c] = wh[a, h, c].
    wh_flat = jnp.transpose(wh, (1, 0, 2)).reshape(H, AC)
    bh_flat = bh.reshape(1, AC)
    # Constant block-diagonal ones matrix used for per-head softmax denominators.
    blockdiag = jnp.kron(jnp.eye(A, dtype=jnp.float32),
                         jnp.ones((C, C), jnp.float32))                       # (AC, AC)

    # Batch tiling (perf review):
    #  * whole batch in a single block when small (no partial tiles, one grid step),
    #  * for larger batches use fat tiles but ensure >= 2 grid steps so the
    #    "parallel" axis can shard across the two TensorCores on v7x.
    if B <= 256:
        tb = B
    else:
        tb = min(tile_b, _round_up(pl.cdiv(B, 2), 8))
        tb = _round_up(max(tb, 8), 8)
    grid = (pl.cdiv(B, tb),)

    const = lambda shape: pl.BlockSpec(shape, lambda i: (0,) * len(shape))

    out_flat = pl.pallas_call(
        make_discrete_actor_kernel(A, C),
        out_shape=jax.ShapeDtypeStruct((B, AC), jnp.float32),
        grid=grid,
        in_specs=[
            pl.BlockSpec((tb, S), lambda i: (i, 0)),   # state: tiled over batch
            const((S, H)),                             # W1
            const((1, H)),                             # b1
            const((H, H)),                             # W2
            const((1, H)),                             # b2
            const((H, AC)),                            # fused head weights
            const((1, AC)),                            # fused head biases
            const((AC, AC)),                           # block-diagonal ones (softmax denom)
        ],
        out_specs=pl.BlockSpec((tb, AC), lambda i: (i, 0)),
        compiler_params=pltpu.CompilerParams(
            dimension_semantics=("parallel",)),
    )(state, w1, b1, w2, b2, wh_flat, bh_flat, blockdiag)

    # free layout plumbing back to the PyTorch output shape
    return out_flat.reshape(B, A, C)


def init_params(key, state_dim, action_dim, action_space_size, hidden_dim):
    """Deterministic init mimicking nn.Linear's U(-1/sqrt(fan_in), 1/sqrt(fan_in))."""
    ks = jax.random.split(key, 6)

    def unif(k, shape, fan_in):
        bound = 1.0 / jnp.sqrt(jnp.float32(fan_in))
        return jax.random.uniform(k, shape, jnp.float32, -bound, bound)

    w1 = unif(ks[0], (state_dim, hidden_dim), state_dim)
    b1 = unif(ks[1], (1, hidden_dim), state_dim)
    w2 = unif(ks[2], (hidden_dim, hidden_dim), hidden_dim)
    b2 = unif(ks[3], (1, hidden_dim), hidden_dim)
    wh = unif(ks[4], (action_dim, hidden_dim, action_space_size), hidden_dim)
    bh = unif(ks[5], (action_dim, action_space_size), hidden_dim)
    return (w1, b1, w2, b2, wh, bh)


def _reference_forward(state, params):
    """Pure-JAX reference matching the PyTorch module (finite-logits path)."""
    if state.ndim == 1:
        state = state[None, :]
    w1, b1, w2, b2, wh, bh = params
    h = jnp.maximum(state @ w1 + b1, 0.0)
    h = jnp.maximum(h @ w2 + b2, 0.0)
    logits = jnp.einsum("bh,ahc->bac", h, wh) + bh[None]
    logits = logits - jnp.max(logits, axis=-1, keepdims=True)
    p = jax.nn.softmax(logits, axis=-1)
    return p / (jnp.sum(p, axis=-1, keepdims=True) + 1e-8)


if __name__ == "__main__":
    # Small shapes consistent with the module: batch=2, state_dim=32,
    # action_dim=4 (beams), action_space_size=8 (cells), hidden_dim=32.
    batch, state_dim, action_dim, action_space_size, hidden_dim = 2, 32, 4, 8, 32

    key = jax.random.PRNGKey(0)
    k_state, k_params = jax.random.split(key)
    state = jax.random.normal(k_state, (batch, state_dim), jnp.float32)
    params = init_params(k_params, state_dim, action_dim, action_space_size, hidden_dim)

    # small batch: single grid step
    probs = jax.block_until_ready(discrete_actor_forward(state, params))
    assert probs.shape == (batch, action_dim, action_space_size)
    assert bool(jnp.all(jnp.abs(jnp.sum(probs, axis=-1) - 1.0) < 1e-3))
    ref = _reference_forward(state, params)
    assert bool(jnp.all(jnp.abs(probs - ref) < 1e-3))

    # larger batch: exercises the multi-step "parallel" grid (tb=160, 2 steps)
    big_state = jax.random.normal(jax.random.PRNGKey(1), (320, state_dim), jnp.float32)
    probs_big = jax.block_until_ready(discrete_actor_forward(big_state, params))
    ref_big = _reference_forward(big_state, params)
    assert probs_big.shape == (320, action_dim, action_space_size)
    assert bool(jnp.all(jnp.abs(probs_big - ref_big) < 1e-3))

    # 1-D state path (torch's unsqueeze(0))
    probs_1d = jax.block_until_ready(discrete_actor_forward(state[0], params))
    assert probs_1d.shape == (1, action_dim, action_space_size)

    print("KERNEL_OK")
</pallas_src>

<mosaic_0001>
module attributes {stable_mosaic.version = 11 : i64} {
  func.func @kernel(%arg0: i32, %arg1: memref<2x32xf32, #tpu.memory_space<vmem>>, %arg2: memref<32x32xf32, #tpu.memory_space<vmem>>, %arg3: memref<1x32xf32, #tpu.memory_space<vmem>>, %arg4: memref<32x32xf32, #tpu.memory_space<vmem>>, %arg5: memref<1x32xf32, #tpu.memory_space<vmem>>, %arg6: memref<32x32xf32, #tpu.memory_space<vmem>>, %arg7: memref<1x32xf32, #tpu.memory_space<vmem>>, %arg8: memref<32x32xf32, #tpu.memory_space<vmem>>, %arg9: memref<2x32xf32, #tpu.memory_space<vmem>>) attributes {dimension_semantics = [#tpu.dimension_semantics<parallel>], iteration_bounds = array<i64: 1>, scalar_prefetch = 0 : i64, scratch_operands = 0 : i64, tpu.core_type = #tpu.core_type<tc>, window_params = [{transform_indices = @transform_0, window_bounds = array<i64: 2, 32>}, {pipeline_mode = #tpu.pipeline_mode<synchronous>, transform_indices = @transform_1, window_bounds = array<i64: 32, 32>}, {pipeline_mode = #tpu.pipeline_mode<synchronous>, transform_indices = @transform_2, window_bounds = array<i64: 1, 32>}, {pipeline_mode = #tpu.pipeline_mode<synchronous>, transform_indices = @transform_3, window_bounds = array<i64: 32, 32>}, {pipeline_mode = #tpu.pipeline_mode<synchronous>, transform_indices = @transform_4, window_bounds = array<i64: 1, 32>}, {pipeline_mode = #tpu.pipeline_mode<synchronous>, transform_indices = @transform_5, window_bounds = array<i64: 32, 32>}, {pipeline_mode = #tpu.pipeline_mode<synchronous>, transform_indices = @transform_6, window_bounds = array<i64: 1, 32>}, {pipeline_mode = #tpu.pipeline_mode<synchronous>, transform_indices = @transform_7, window_bounds = array<i64: 32, 32>}, {transform_indices = @transform_8, window_bounds = array<i64: 2, 32>}]} {
    %c0 = arith.constant 0 : index
    %c0_0 = arith.constant 0 : index
    %0 = vector.load %arg1[%c0, %c0_0] : memref<2x32xf32, #tpu.memory_space<vmem>>, vector<2x32xf32>
    %c0_1 = arith.constant 0 : index
    %c0_2 = arith.constant 0 : index
    %1 = vector.load %arg2[%c0_1, %c0_2] : memref<32x32xf32, #tpu.memory_space<vmem>>, vector<32x32xf32>
    %cst = arith.constant dense<0.000000e+00> : vector<2x32xf32>
    %2 = tpu.matmul %0, %1, %cst {dimension_numbers = #tpu.dot_dimension_numbers<[1], [0], [0], [1], [0, 0, 1, 1], [], []>} : vector<2x32xf32>, vector<32x32xf32>, vector<2x32xf32> -> vector<2x32xf32>
    %c0_3 = arith.constant 0 : index
    %c0_4 = arith.constant 0 : index
    %3 = vector.load %arg3[%c0_3, %c0_4] : memref<1x32xf32, #tpu.memory_space<vmem>>, vector<1x32xf32>
    %4 = vector.broadcast %3 : vector<1x32xf32> to vector<2x32xf32>
    %5 = arith.addf %2, %4 : vector<2x32xf32>
    %cst_5 = arith.constant 0.000000e+00 : f32
    %6 = vector.broadcast %cst_5 : f32 to vector<2x32xf32>
    %7 = arith.maximumf %5, %6 : vector<2x32xf32>
    %c0_6 = arith.constant 0 : index
    %c0_7 = arith.constant 0 : index
    %8 = vector.load %arg4[%c0_6, %c0_7] : memref<32x32xf32, #tpu.memory_space<vmem>>, vector<32x32xf32>
    %cst_8 = arith.constant dense<0.000000e+00> : vector<2x32xf32>
    %9 = tpu.matmul %7, %8, %cst_8 {dimension_numbers = #tpu.dot_dimension_numbers<[1], [0], [0], [1], [0, 0, 1, 1], [], []>} : vector<2x32xf32>, vector<32x32xf32>, vector<2x32xf32> -> vector<2x32xf32>
    %c0_9 = arith.constant 0 : index
    %c0_10 = arith.constant 0 : index
    %10 = vector.load %arg5[%c0_9, %c0_10] : memref<1x32xf32, #tpu.memory_space<vmem>>, vector<1x32xf32>
    %11 = vector.broadcast %10 : vector<1x32xf32> to vector<2x32xf32>
    %12 = arith.addf %9, %11 : vector<2x32xf32>
    %cst_11 = arith.constant 0.000000e+00 : f32
    %13 = vector.broadcast %cst_11 : f32 to vector<2x32xf32>
    %14 = arith.maximumf %12, %13 : vector<2x32xf32>
    %c0_12 = arith.constant 0 : index
    %c0_13 = arith.constant 0 : index
    %15 = vector.load %arg6[%c0_12, %c0_13] : memref<32x32xf32, #tpu.memory_space<vmem>>, vector<32x32xf32>
    %cst_14 = arith.constant dense<0.000000e+00> : vector<2x32xf32>
    %16 = tpu.matmul %14, %15, %cst_14 {dimension_numbers = #tpu.dot_dimension_numbers<[1], [0], [0], [1], [0, 0, 1, 1], [], []>} : vector<2x32xf32>, vector<32x32xf32>, vector<2x32xf32> -> vector<2x32xf32>
    %c0_15 = arith.constant 0 : index
    %c0_16 = arith.constant 0 : index
    %17 = vector.load %arg7[%c0_15, %c0_16] : memref<1x32xf32, #tpu.memory_space<vmem>>, vector<1x32xf32>
    %18 = vector.broadcast %17 : vector<1x32xf32> to vector<2x32xf32>
    %19 = arith.addf %16, %18 : vector<2x32xf32>
    %20 = vector.extract_strided_slice %19 {offsets = [0, 0], sizes = [2, 8], strides = [1, 1]} : vector<2x32xf32> to vector<2x8xf32>
    %cst_17 = arith.constant dense<0xFF800000> : vector<2xf32>
    %21 = vector.multi_reduction <maximumf>, %20, %cst_17 [1] : vector<2x8xf32> to vector<2xf32>
    %22 = vector.shape_cast %21 : vector<2xf32> to vector<2x1xf32>
    %23 = vector.shape_cast %22 : vector<2x1xf32> to vector<2x1xf32>
    %24 = vector.broadcast %23 : vector<2x1xf32> to vector<2x8xf32>
    %25 = vector.extract_strided_slice %19 {offsets = [0, 8], sizes = [2, 8], strides = [1, 1]} : vector<2x32xf32> to vector<2x8xf32>
    %cst_18 = arith.constant dense<0xFF800000> : vector<2xf32>
    %26 = vector.multi_reduction <maximumf>, %25, %cst_18 [1] : vector<2x8xf32> to vector<2xf32>
    %27 = vector.shape_cast %26 : vector<2xf32> to vector<2x1xf32>
    %28 = vector.shape_cast %27 : vector<2x1xf32> to vector<2x1xf32>
    %29 = vector.broadcast %28 : vector<2x1xf32> to vector<2x8xf32>
    %30 = vector.extract_strided_slice %19 {offsets = [0, 16], sizes = [2, 8], strides = [1, 1]} : vector<2x32xf32> to vector<2x8xf32>
    %cst_19 = arith.constant dense<0xFF800000> : vector<2xf32>
    %31 = vector.multi_reduction <maximumf>, %30, %cst_19 [1] : vector<2x8xf32> to vector<2xf32>
    %32 = vector.shape_cast %31 : vector<2xf32> to vector<2x1xf32>
    %33 = vector.shape_cast %32 : vector<2x1xf32> to vector<2x1xf32>
    %34 = vector.broadcast %33 : vector<2x1xf32> to vector<2x8xf32>
    %35 = vector.extract_strided_slice %19 {offsets = [0, 24], sizes = [2, 8], strides = [1, 1]} : vector<2x32xf32> to vector<2x8xf32>
    %cst_20 = arith.constant dense<0xFF800000> : vector<2xf32>
    %36 = vector.multi_reduction <maximumf>, %35, %cst_20 [1] : vector<2x8xf32> to vector<2xf32>
    %37 = vector.shape_cast %36 : vector<2xf32> to vector<2x1xf32>
    %38 = vector.shape_cast %37 : vector<2x1xf32> to vector<2x1xf32>
    %39 = vector.broadcast %38 : vector<2x1xf32> to vector<2x8xf32>
    %40 = tpu.concatenate %24, %29, %34, %39 in 1 : vector<2x8xf32>, vector<2x8xf32>, vector<2x8xf32>, vector<2x8xf32> -> vector<2x32xf32>
    %41 = arith.subf %19, %40 : vector<2x32xf32>
    %42 = math.exp %41 : vector<2x32xf32>
    %c0_21 = arith.constant 0 : index
    %c0_22 = arith.constant 0 : index
    %43 = vector.load %arg8[%c0_21, %c0_22] : memref<32x32xf32, #tpu.memory_space<vmem>>, vector<32x32xf32>
    %cst_23 = arith.constant dense<0.000000e+00> : vector<2x32xf32>
    %44 = tpu.matmul %42, %43, %cst_23 {dimension_numbers = #tpu.dot_dimension_numbers<[1], [0], [0], [1], [0, 0, 1, 1], [], []>} : vector<2x32xf32>, vector<32x32xf32>, vector<2x32xf32> -> vector<2x32xf32>
    %cst_24 = arith.constant 9.99999993E-9 : f32
    %45 = vector.broadcast %cst_24 : f32 to vector<2x32xf32>
    %46 = arith.addf %44, %45 : vector<2x32xf32>
    %47 = arith.divf %42, %46 : vector<2x32xf32>
    %c0_25 = arith.constant 0 : index
    %c0_26 = arith.constant 0 : index
    %48 = vector.load %arg9[%c0_25, %c0_26] : memref<2x32xf32, #tpu.memory_space<vmem>>, vector<2x32xf32>
    tpu.vector_store %arg9[%c0_25, %c0_26], %47 {strides = array<i32>} : memref<2x32xf32, #tpu.memory_space<vmem>>, vector<2x32xf32>,
    return
  }
  func.func @transform_0(%arg0: i32) -> (i32, i32) {
    %c0_i32 = arith.constant 0 : i32
    %c0_i32_0 = arith.constant 0 : i32
    return %arg0, %c0_i32 : i32, i32
  }
  func.func @transform_1(%arg0: i32) -> (i32, i32) {
    %c0_i32 = arith.constant 0 : i32
    %c0_i32_0 = arith.constant 0 : i32
    %c0_i32_1 = arith.constant 0 : i32
    return %c0_i32, %c0_i32_0 : i32, i32
  }
  func.func @transform_2(%arg0: i32) -> (i32, i32) {
    %c0_i32 = arith.constant 0 : i32
    %c0_i32_0 = arith.constant 0 : i32
    %c0_i32_1 = arith.constant 0 : i32
    return %c0_i32, %c0_i32_0 : i32, i32
  }
  func.func @transform_3(%arg0: i32) -> (i32, i32) {
    %c0_i32 = arith.constant 0 : i32
    %c0_i32_0 = arith.constant 0 : i32
    %c0_i32_1 = arith.constant 0 : i32
    return %c0_i32, %c0_i32_0 : i32, i32
  }
  func.func @transform_4(%arg0: i32) -> (i32, i32) {
    %c0_i32 = arith.constant 0 : i32
    %c0_i32_0 = arith.constant 0 : i32
    %c0_i32_1 = arith.constant 0 : i32
    return %c0_i32, %c0_i32_0 : i32, i32
  }
  func.func @transform_5(%arg0: i32) -> (i32, i32) {
    %c0_i32 = arith.constant 0 : i32
    %c0_i32_0 = arith.constant 0 : i32
    %c0_i32_1 = arith.constant 0 : i32
    return %c0_i32, %c0_i32_0 : i32, i32
  }
  func.func @transform_6(%arg0: i32) -> (i32, i32) {
    %c0_i32 = arith.constant 0 : i32
    %c0_i32_0 = arith.constant 0 : i32
    %c0_i32_1 = arith.constant 0 : i32
    return %c0_i32, %c0_i32_0 : i32, i32
  }
  func.func @transform_7(%arg0: i32) -> (i32, i32) {
    %c0_i32 = arith.constant 0 : i32
    %c0_i32_0 = arith.constant 0 : i32
    %c0_i32_1 = arith.constant 0 : i32
    return %c0_i32, %c0_i32_0 : i32, i32
  }
  func.func @transform_8(%arg0: i32) -> (i32, i32) {
    %c0_i32 = arith.constant 0 : i32
    %c0_i32_0 = arith.constant 0 : i32
    return %arg0, %c0_i32 : i32, i32
  }
}

</mosaic_0001>

<bundles_post_ra>
// kernel: discrete_actor_forward.1
= control target key start
LH: loop header
LB: loop body
LE: loop exit
PB: predicated region body
PF: predicated region fallthrough
CT: control target
= control target key end

     0   :  { %v497_v0 = vmov 0.0|0.0   ;;  %vm498_vm0 = vmmov 0   ;;  %v499_v4 = vmov 0.0   ;;  %vm41_vm1 = vcmask 261120   ;;  %s624_s1 = inlined_call_operand.vmem [shape: f32[32,32], index: 1, kind: input, shape index: {}]   ;;  %s625_s3 = inlined_call_operand.vmem [shape: f32[32,32], index: 3, kind: input, shape index: {}]   ;;  %s626_s0 = inlined_call_operand.vmem [shape: f32[2,32], index: 0, kind: input, shape index: {}]   ;;  %s627_s5 = inlined_call_operand.vmem [shape: f32[32,32], index: 5, kind: input, shape index: {}]   ;;  %s628_s2 = inlined_call_operand.vmem [shape: f32[1,32], index: 2, kind: input, shape index: {}]   ;;  %s629_s4 = inlined_call_operand.vmem [shape: f32[1,32], index: 4, kind: input, shape index: {}]   ;;  %s630_s6 = inlined_call_operand.vmem [shape: f32[1,32], index: 6, kind: input, shape index: {}]   ;;  %s631_s7 = inlined_call_operand.vmem [shape: f32[32,32], index: 7, kind: input, shape index: {}]   ;;  %s632_s8 = inlined_call_operand.vmem [shape: f32[2,32], index: 8, kind: output, shape index: {}]  }
   0x1   :  { %466 = vmatprep.subr.bf16.mxu0 %v497_v0  ;;  %v30_v1 = vld [vmem:[%s624_s1] sm:$0xff]  ;;  %v31_v2 = vld [vmem:[%s624_s1 + $0x8] sm:$0xff]  ;;  %v32_v3 = vld [vmem:[%s624_s1 + $0x10] sm:$0xff]  ;;  %430 = vmatprep.mubr.msk.f32.mxu0 %vm498_vm0, %v499_v4  ;;  %vm293_vm2 = vcmask 189568   ;;  %vm285_vm3 = vcmask 58368   ;;  %vm297_vm4 = vcmask 255168  }
   0x2   :  { %v467_v5 = vpack.c.bf16 %v31_v2, %v30_v1  ;;  %v33_v6 = vld [vmem:[%s624_s1 + $0x18] sm:$0xff]  ;;  %472 = vmatprep.subr.bf16.mxu1 %v497_v0  ;;  %v116_v7 = vld [vmem:[%s625_s3] sm:$0xff]  ;;  %441 = vmatprep.mubr.msk.f32.mxu1 %vm498_vm0, %v499_v4  ;;  %v117_v8 = vld [vmem:[%s625_s3 + $0x8] sm:$0xff]  ;;  %vm289_vm5 = vcmask 123968   ;;  %vm301_vm6 = vcmask 64512   ;;  %vm303_vm7 = vcmask 130048  }
   0x3   :  { %v470_v9 = vpack.c.bf16 %v33_v6, %v32_v3  ;;  %v473_v10 = vpack.c.bf16 %v117_v8, %v116_v7  ;;  %v29_v11 = vld [vmem:[%s626_s0] sm:$0x3]  ;;  %v118_v12 = vld [vmem:[%s625_s3 + $0x10] sm:$0xff]  ;;  %v119_v13 = vld [vmem:[%s625_s3 + $0x18] sm:$0xff]  ;;  %vm305_vm8 = vcmask 195584   ;;  %vm389_vm9 = vcmask 254976  }
   0x4   :  { %468 = vmatpush3.bf16.msra.mxu0 %v467_v5  ;;  %v476_v14 = vpack.c.bf16 %v119_v13, %v118_v12  ;;  %v201_v15 = vld [vmem:[%s627_s5] sm:$0xff]  ;;  %v202_v16 = vld [vmem:[%s627_s5 + $0x8] sm:$0xff]  ;;  %v203_v23 = vld [vmem:[%s627_s5 + $0x10] sm:$0xff] }
   0x5   :  { %469 = vmatprep.subr.bf16.mxu0 %v497_v0  ;;  %474 = vmatpush3.bf16.msra.mxu1 %v473_v10  ;;  %v479_v17 = vpack.c.bf16 %v202_v16, %v201_v15  ;;  %v395_v18 = vld [vmem:[%s628_s2] ss:$0 sm:$0xff]  ;;  %v204_v24 = vld [vmem:[%s627_s5 + $0x18] sm:$0xff]  ;;  %v311_v40 = vld [vmem:[%s631_s7 + $0x8] sm:$0xff] }
   0x6   :  { %475 = vmatprep.subr.bf16.mxu1 %v497_v0  ;;  %v482_v25 = vpack.c.bf16 %v204_v24, %v203_v23  ;;  %v397_v26 = vld [vmem:[%s629_s4] ss:$0 sm:$0xff]  ;;  %v312_v41 = vld [vmem:[%s631_s7 + $0x10] sm:$0xff]  ;;  %v313_v43 = vld [vmem:[%s631_s7 + $0x18] sm:$0xff] }
   0x7   :  { %v399_v31 = vld [vmem:[%s630_s6] ss:$0 sm:$0xff]  ;;  %v488_v44 = vpack.c.bf16 %v313_v43, %v312_v41 }
   0x8   :  { %471 = vmatpush3.bf16.msra.mxu0 %v470_v9  ;;  %v310_v39 = vld [vmem:[%s631_s7] sm:$0xff] }
   0x9   :  { %478 = vmatprep.subr.bf16.mxu0 %v497_v0  ;;  %477 = vmatpush3.bf16.msra.mxu1 %v476_v14  ;;  %v485_v42 = vpack.c.bf16 %v311_v40, %v310_v39 }
   0xa   :  { %484 = vmatprep.subr.bf16.mxu1 %v497_v0 }
   0xb   :  { %431 = vmatmul.mubr.msk.f32.vlgmr.msra.gmra.mrb[0].mxu0 %vm41_vm1, %v29_v11 }
   0xc   :  { %452 = vmatprep.mubr.msk.f32.mxu0 %vm498_vm0, %v499_v4  ;;  %480 = vmatpush3.bf16.msra.mxu0 %v479_v17 }
   0xd   :  { %481 = vmatprep.subr.bf16.mxu0 %v497_v0 }
  0x10   :  { %483 = vmatpush3.bf16.msra.mxu0 %v482_v25 }
  0xde   :  { %v111_v19 = vpop.f32.mrb[0].mxu0 }
  0xdf   :  { %v112_v20 = vadd.f32 %v395_v18, %v111_v19  ;;  %v432_v21 = vpop.f32.mrb[1].mxu0 }
  0xe1   :  { %v115_v22 = vmax.f32 %v112_v20, 0.0 }
  0xe3   :  { %442 = vmatmul.mubr.msk.f32.vlgmr.msra.gmra.mrb[0].mxu1 %vm41_vm1, %v115_v22 }
  0xe4   :  { %463 = vmatprep.mubr.msk.f32.mxu1 %vm498_vm0, %v499_v4  ;;  %486 = vmatpush3.bf16.msra.mxu1 %v485_v42 }
  0xe5   :  { %487 = vmatprep.subr.bf16.mxu1 %v497_v0 }
  0xe8   :  { %489 = vmatpush3.bf16.msra.mxu1 %v488_v44 }
 0x1b6   :  { %v196_v27 = vpop.f32.mrb[0].mxu1 }
 0x1b7   :  { %v197_v28 = vadd.f32 %v397_v26, %v196_v27  ;;  %v443_v29 = vpop.f32.mrb[1].mxu1 }
 0x1b9   :  { %v200_v30 = vmax.f32 %v197_v28, 0.0 }
 0x1bb   :  { %453 = vmatmul.mubr.msk.f32.vlgmr.msra.gmra.mrb[2].mxu0 %vm41_vm1, %v200_v30 }
 0x28e   :  { %v281_v32 = vpop.f32.mrb[2].mxu0 }
 0x28f   :  { %v282_v33 = vadd.f32 %v399_v31, %v281_v32  ;;  %v454_v34 = vpop.f32.mrb[3].mxu0 }
 0x291   :  { %v294_v35 = vsel %vm293_vm2, %v282_v33, -inf  ;;  %v286_v36 = vsel %vm285_vm3, %v282_v33, -inf  ;;  %v298_v37 = vsel %vm297_vm4, %v282_v33, -inf  ;;  %v290_v38 = vsel %vm289_vm5, %v282_v33, -inf }
 0x292   :  { %295 = vmax.xlane.f32.xlu1 %v294_v35  ;;  %287 = vmax.xlane.f32.xlu0 %v286_v36 }
 0x296   :  { %299 = vmax.xlane.f32.xlu1 %v298_v37  ;;  %291 = vmax.xlane.f32.xlu0 %v290_v38 }
 0x31f   :  { %v296_v45 = vpop.xlane.xlu1 %295  ;;  %v288_v46 = vpop.xlane.xlu0 %287 }
 0x323   :  { %v292_v47 = vpop.xlane.xlu0 %291  ;;  %v300_v49 = vpop.xlane.xlu1 %299 }
 0x324   :  { %v302_v48 = vsel %vm301_vm6, %v288_v46, %v292_v47 }
 0x325   :  { %v304_v50 = vsel %vm303_vm7, %v302_v48, %v296_v45 }
 0x326   :  { %v306_v51 = vsel %vm305_vm8, %v304_v50, %v300_v49 }
 0x327   :  { %v307_v52 = vsub.f32 %v282_v33, %v306_v51 }
 0x329   :  { %v308_v53 = vmul.f32 1.442695, %v307_v52 }
 0x32b   :  { %493 = vpow2.f32 %v308_v53 }
 0x335   :  { %v494_v54 = vpop.eup %493 }
 0x336   :  { %464 = vmatmul.mubr.msk.f32.vlgmr.msra.gmra.mrb[2].mxu1 %vm41_vm1, %v494_v54 }
 0x409   :  { %v383_v55 = vpop.f32.mrb[2].mxu1 }
 0x40a   :  { %v384_v56 = vadd.f32 1e-08, %v383_v55  ;;  %v465_v57 = vpop.f32.mrb[3].mxu1 }
 0x40c   :  { %495 = vrcp.f32 %v384_v56 }
 0x416   :  { %v496_v58 = vpop.eup %495 }
 0x417   :  { %v388_v59 = vmul.f32 %v496_v58, %v494_v54 }
 0x419   :  { %390 = vst.msk [vmem:[%s632_s8] sm:$0x3] %vm389_vm9, %v388_v59 }

</bundles_post_ra>
